<compile_context>
chip_gen: v7x
topology: tpu7x:2x2x1
jax: 0.10.0
libtpu: 0.0.40
codegen_flags: <defaults>
</compile_context>

<pallas_src>
import jax
import jax.numpy as jnp
from jax import lax
from jax.experimental import pallas as pl
from jax.experimental.pallas import tpu as pltpu


def _latent_mapping_kernel(z_ref, wt_ref, gb_ref, o_ref):
    # Linear (bias-free; the bias is cancelled by the BN mean subtraction):
    #   y = z @ W^T  -> MXU, bf16 inputs, f32 accumulation.       [B, tn]
    y = jnp.dot(z_ref[...], wt_ref[...], preferred_element_type=jnp.float32)

    # BatchNorm1d (training mode): per-feature batch statistics (biased var).
    # NOTE: the block holds the ENTIRE batch; B must not be tiled here.
    inv_b = 1.0 / y.shape[0]
    mean = jnp.sum(y, axis=0, keepdims=True) * inv_b          # [1, tn]  (XLU)
    centered = y - mean
    var = jnp.sum(centered * centered, axis=0, keepdims=True) * inv_b
    inv_std = lax.rsqrt(var + 1e-5)                            # EUP slot

    gamma = gb_ref[0:1, :]                                     # [1, tn]
    beta = gb_ref[1:2, :]                                      # [1, tn]
    scale = inv_std * gamma                                    # [1, tn]
    o_ref[...] = (centered * scale + beta).astype(o_ref.dtype)


def latent_mapping_forward(z, weight, bias, gamma, beta):
    """z: [B, 2*z_dim], weight: PyTorch-style [z_dim, 2*z_dim] -> [1, B, z_dim]."""
    B, in_dim = z.shape
    z_dim = weight.shape[0]
    assert in_dim == 2 * z_dim
    # The Linear bias is exactly cancelled by BatchNorm's batch-mean
    # subtraction (training-mode forward); keep it for API parity only.
    del bias

    # ---- one-time layout plumbing in the wrapper (not the kernel) ----------
    # Pad the feature axis to a multiple of 128: lane-dense, unmasked stores,
    # and tn below is guaranteed to divide the padded width.
    z_pad = ((z_dim + 127) // 128) * 128
    pad = z_pad - z_dim

    w_t = jnp.transpose(weight).astype(jnp.bfloat16)           # [2*z_dim, z_dim]
    z_bf = z.astype(jnp.bfloat16)                              # [B, 2*z_dim]
    gamma = jnp.asarray(gamma, jnp.float32).reshape(1, z_dim)
    beta = jnp.asarray(beta, jnp.float32).reshape(1, z_dim)
    if pad:
        # Zero weight columns -> y==0 in padded features; BN maps them to
        # beta(=0) there, and we slice them off afterwards.
        w_t = jnp.pad(w_t, ((0, 0), (0, pad)))
        gamma = jnp.pad(gamma, ((0, 0), (0, pad)), constant_values=1.0)
        beta = jnp.pad(beta, ((0, 0), (0, pad)))
    gb = jnp.concatenate([gamma, beta], axis=0)                # [2, z_pad] f32

    # ---- feature tiling -----------------------------------------------------
    # BN stats are independent per feature, so feature tiles need no
    # cross-tile communication.  tn always divides z_pad; cap at 256 (VMEM
    # safe on v5e/v6e/v7x) and prefer >=2 tiles so both v7x TCs get work.
    if z_pad % 256 == 0 and z_pad >= 512:
        tn = 256
    elif z_pad >= 256:
        tn = 128
    else:
        tn = z_pad                                             # single 128 tile
    n_tiles = z_pad // tn
    assert n_tiles * tn == z_pad

    # VMEM budget: double-buffered bf16 W^T tile + bf16 z block + f32 out
    # tile + f32 [gamma;beta] tile, plus f32 temporaries, with 2x slack.
    est = (2 * in_dim * tn * 2            # W^T tiles (bf16, double-buffered)
           + 2 * B * in_dim * 2           # z block   (bf16, double-buffered)
           + 2 * B * tn * 4               # out tiles (f32, double-buffered)
           + 2 * 2 * tn * 4               # gamma/beta tiles
           + 4 * B * tn * 4)              # y / centered / epilogue temps
    vmem_limit = int(min(max(2 * est, 16 * 1024 * 1024), 64 * 1024 * 1024))

    out = pl.pallas_call(
        _latent_mapping_kernel,
        out_shape=jax.ShapeDtypeStruct((B, z_pad), jnp.float32),
        grid=(n_tiles,),
        in_specs=[
            # z block index is constant across tiles (tiny at this B; for very
            # large B, single-buffer it or stream it via a K grid axis).
            pl.BlockSpec((B, in_dim), lambda j: (0, 0)),       # z (full batch)
            pl.BlockSpec((in_dim, tn), lambda j: (0, j)),      # W^T column tile
            pl.BlockSpec((2, tn), lambda j: (0, j)),           # [gamma; beta]
        ],
        out_specs=pl.BlockSpec((B, tn), lambda j: (0, j)),
        compiler_params=pltpu.CompilerParams(
            dimension_semantics=("parallel",),
            vmem_limit_bytes=vmem_limit,
        ),
    )(z_bf, w_t, gb)

    if pad:
        out = out[:, :z_dim]
    # .unsqueeze(0)
    return out[None, :, :]


if __name__ == "__main__":
    z_dim = 32
    B = 8

    key = jax.random.PRNGKey(0)
    k_z, k_w, k_b = jax.random.split(key, 3)

    # Inputs / parameters (deterministic, synthetic).
    z = jax.random.normal(k_z, (B, 2 * z_dim), dtype=jnp.float32)
    # Linear params (PyTorch-style uniform init bound = 1/sqrt(fan_in)).
    bound = 1.0 / jnp.sqrt(2.0 * z_dim)
    weight = jax.random.uniform(k_w, (z_dim, 2 * z_dim), jnp.float32, -bound, bound)
    bias = jax.random.uniform(k_b, (1, z_dim), jnp.float32, -bound, bound)
    # BatchNorm1d default affine params.
    gamma = jnp.ones((1, z_dim), jnp.float32)
    beta = jnp.zeros((1, z_dim), jnp.float32)

    out = latent_mapping_forward(z, weight, bias, gamma, beta)
    out = jax.block_until_ready(out)

    # Reference in plain f32 JAX (full PyTorch math, including the bias that
    # the BN mean subtraction cancels exactly).
    y_ref = z @ weight.T + bias
    m = y_ref.mean(axis=0, keepdims=True)
    v = ((y_ref - m) ** 2).mean(axis=0, keepdims=True)
    ref = ((y_ref - m) / jnp.sqrt(v + 1e-5) * gamma + beta)[None]

    assert out.shape == (1, B, z_dim), out.shape
    # Tolerance reflects bf16 rounding of z / W (f32 accumulate), amplified by
    # the 1/std normalization; outputs are ~N(0,1) so 5e-2 is still tight.
    assert jnp.allclose(out, ref, atol=5e-2, rtol=5e-2), (
        float(jnp.max(jnp.abs(out - ref)))
    )
    print("KERNEL_OK")
</pallas_src>

<mosaic_0001>
module attributes {stable_mosaic.version = 11 : i64} {
  func.func @_latent_mapping_kernel(%arg0: i32, %arg1: memref<8x64xbf16, #tpu.memory_space<vmem>>, %arg2: memref<64x128xbf16, #tpu.memory_space<vmem>>, %arg3: memref<2x128xf32, #tpu.memory_space<vmem>>, %arg4: memref<8x128xf32, #tpu.memory_space<vmem>>) attributes {dimension_semantics = [#tpu.dimension_semantics<parallel>], iteration_bounds = array<i64: 1>, scalar_prefetch = 0 : i64, scratch_operands = 0 : i64, tpu.core_type = #tpu.core_type<tc>, window_params = [{pipeline_mode = #tpu.pipeline_mode<synchronous>, transform_indices = @transform_0, window_bounds = array<i64: 8, 64>}, {transform_indices = @transform_1, window_bounds = array<i64: 64, 128>}, {transform_indices = @transform_2, window_bounds = array<i64: 2, 128>}, {transform_indices = @transform_3, window_bounds = array<i64: 8, 128>}]} {
    %c0 = arith.constant 0 : index
    %c0_0 = arith.constant 0 : index
    %0 = vector.load %arg1[%c0, %c0_0] : memref<8x64xbf16, #tpu.memory_space<vmem>>, vector<8x64xbf16>
    %c0_1 = arith.constant 0 : index
    %c0_2 = arith.constant 0 : index
    %1 = vector.load %arg2[%c0_1, %c0_2] : memref<64x128xbf16, #tpu.memory_space<vmem>>, vector<64x128xbf16>
    %cst = arith.constant dense<0.000000e+00> : vector<8x128xf32>
    %2 = tpu.matmul %0, %1, %cst {dimension_numbers = #tpu.dot_dimension_numbers<[1], [0], [0], [1], [0, 0, 1, 1], [], []>} : vector<8x64xbf16>, vector<64x128xbf16>, vector<8x128xf32> -> vector<8x128xf32>
    %cst_3 = arith.constant dense<0.000000e+00> : vector<128xf32>
    %3 = vector.multi_reduction <add>, %2, %cst_3 [0] : vector<8x128xf32> to vector<128xf32>
    %4 = vector.shape_cast %3 : vector<128xf32> to vector<1x128xf32>
    %cst_4 = arith.constant 1.250000e-01 : f32
    %5 = vector.broadcast %cst_4 : f32 to vector<1x128xf32>
    %6 = arith.mulf %4, %5 : vector<1x128xf32>
    %7 = vector.broadcast %6 : vector<1x128xf32> to vector<8x128xf32>
    %8 = arith.subf %2, %7 : vector<8x128xf32>
    %9 = arith.mulf %8, %8 : vector<8x128xf32>
    %cst_5 = arith.constant dense<0.000000e+00> : vector<128xf32>
    %10 = vector.multi_reduction <add>, %9, %cst_5 [0] : vector<8x128xf32> to vector<128xf32>
    %11 = vector.shape_cast %10 : vector<128xf32> to vector<1x128xf32>
    %cst_6 = arith.constant 1.250000e-01 : f32
    %12 = vector.broadcast %cst_6 : f32 to vector<1x128xf32>
    %13 = arith.mulf %11, %12 : vector<1x128xf32>
    %cst_7 = arith.constant 9.99999974E-6 : f32
    %14 = vector.broadcast %cst_7 : f32 to vector<1x128xf32>
    %15 = arith.addf %13, %14 : vector<1x128xf32>
    %16 = math.rsqrt %15 : vector<1x128xf32>
    %c0_8 = arith.constant 0 : index
    %c0_9 = arith.constant 0 : index
    %17 = vector.load %arg3[%c0_8, %c0_9] : memref<2x128xf32, #tpu.memory_space<vmem>>, vector<1x128xf32>
    %c1 = arith.constant 1 : index
    %c0_10 = arith.constant 0 : index
    %18 = vector.load %arg3[%c1, %c0_10] : memref<2x128xf32, #tpu.memory_space<vmem>>, vector<1x128xf32>
    %19 = arith.mulf %16, %17 : vector<1x128xf32>
    %20 = vector.broadcast %19 : vector<1x128xf32> to vector<8x128xf32>
    %21 = arith.mulf %8, %20 : vector<8x128xf32>
    %22 = vector.broadcast %18 : vector<1x128xf32> to vector<8x128xf32>
    %23 = arith.addf %21, %22 : vector<8x128xf32>
    %c0_11 = arith.constant 0 : index
    %c0_12 = arith.constant 0 : index
    %24 = vector.load %arg4[%c0_11, %c0_12] : memref<8x128xf32, #tpu.memory_space<vmem>>, vector<8x128xf32>
    tpu.vector_store %arg4[%c0_11, %c0_12], %23 {strides = array<i32>} : memref<8x128xf32, #tpu.memory_space<vmem>>, vector<8x128xf32>,
    return
  }
  func.func @transform_0(%arg0: i32) -> (i32, i32) {
    %c0_i32 = arith.constant 0 : i32
    %c0_i32_0 = arith.constant 0 : i32
    %c0_i32_1 = arith.constant 0 : i32
    return %c0_i32, %c0_i32_0 : i32, i32
  }
  func.func @transform_1(%arg0: i32) -> (i32, i32) {
    %c0_i32 = arith.constant 0 : i32
    %c0_i32_0 = arith.constant 0 : i32
    return %c0_i32, %arg0 : i32, i32
  }
  func.func @transform_2(%arg0: i32) -> (i32, i32) {
    %c0_i32 = arith.constant 0 : i32
    %c0_i32_0 = arith.constant 0 : i32
    return %c0_i32, %arg0 : i32, i32
  }
  func.func @transform_3(%arg0: i32) -> (i32, i32) {
    %c0_i32 = arith.constant 0 : i32
    %c0_i32_0 = arith.constant 0 : i32
    return %c0_i32, %arg0 : i32, i32
  }
}

</mosaic_0001>

<bundles_post_ra>
// kernel: tpu_custom_call.1
= control target key start
LH: loop header
LB: loop body
LE: loop exit
PB: predicated region body
PF: predicated region fallthrough
CT: control target
= control target key end

     0   :  { %8 = vsyncpa [#allocation3], 0  ;;  %s351_s0 = inlined_call_operand.hbm [shape: bf16[8,64], index: 0, kind: input, shape index: {}]   ;;  %s352_s1 = inlined_call_operand.hbm [shape: bf16[64,128], index: 1, kind: input, shape index: {}]   ;;  %s353_s2 = inlined_call_operand.vmem [shape: f32[2,128], index: 2, kind: input, shape index: {}]   ;;  %s354_s3 = inlined_call_operand.hbm [shape: f32[8,128], index: 3, kind: output, shape index: {}]  }
   0x1   :  { %9 = vsyncpa [#allocation6], 0 }
   0x2   :  { %10 = vsyncpa [#allocation4], 0  ;;  %s275_s12 = smov [#allocation2]   ;;  %s276_s14 = smov [#allocation5]  }
   0x3   :  { %s17_s13 = sshll.u32 %s275_s12, 4  ;;  %s26_s15 = sshll.u32 %s276_s14, 4  ;;  %s18_s13 = int_to_ptr.vmem [resolvable:$true] %s17_s13  ;;  %s302_s15 = int_to_ptr.vmem [resolvable:$true] %s26_s15 }
   0x4   :  { %s203_s18 = scalar_lea.hbm %s351_s0, 64 }
   0x5   :  { %p204_p0 = scmp.ne.s32.totalorder %s351_s0, %s203_s18  ;;  %p207_p1 = scmp.lt.u32.totalorder %s203_s18, %s351_s0 }
   0x7   :  { %p209_p2 = pnand %p207_p1, %p204_p0 }
   0x9   :  { %212 = shalt.err (!%p209_p2)
}
   0xa   :  { %s213_s23 = scalar_lea.vmem %s18_s13, 64  ;;  %p218_p4 = scmp.lt.s32.totalorder %s18_s13, %s18_s13 }
   0xb   :  { %p214_p3 = scmp.ne.s32.totalorder %s18_s13, %s213_s23  ;;  %p219_p5 = scmp.lt.s32.totalorder %s213_s23, %s213_s23 }
   0xd   :  { %p220_p6 = por %p219_p5, %p218_p4 }
   0xf   :  { %p221_p7 = pnand %p220_p6, %p214_p3 }
  0x11   :  { %224 = shalt.err (!%p221_p7)
}
  0x12   :  { %20 = dma.hbm_to_vmem [thread:$0]  %s351_s0, 64, %s18_s13, [#allocation3]  }
  0x13   :  { %s225_s28 = scalar_lea.hbm %s352_s1, 512 }
  0x14   :  { %p226_p8 = scmp.ne.s32.totalorder %s352_s1, %s225_s28  ;;  %p229_p9 = scmp.lt.u32.totalorder %s225_s28, %s352_s1 }
  0x16   :  { %p231_p10 = pnand %p229_p9, %p226_p8 }
  0x18   :  { %234 = shalt.err (!%p231_p10)
}
  0x19   :  { %s235_s6 = scalar_lea.vmem %s302_s15, 512  ;;  %p240_p12 = scmp.lt.s32.totalorder %s302_s15, %s302_s15 }
  0x1a   :  { %p236_p11 = scmp.ne.s32.totalorder %s302_s15, %s235_s6  ;;  %p241_p13 = scmp.lt.s32.totalorder %s235_s6, %s235_s6 }
  0x1c   :  { %p242_p0 = por %p241_p13, %p240_p12 }
  0x1e   :  { %p243_p1 = pnand %p242_p0, %p236_p11 }
  0x20   :  { %246 = shalt.err (!%p243_p1)
}
  0x21   :  { %s277_s0 = smov 64   ;;  %s278_s7 = smov 4  }
  0x22   :  { %32 = dma.hbm_to_vmem [thread:$0]  %s352_s1, 512, %s302_s15, [#allocation6], %s277_s0, %s277_s0, %s278_s7  }
  0x23   :  { %269 = dma.done.wait [#allocation3], 64  }
  0x24   :  { %270 = vsyncadd [#allocation3], 4294967232 }
  0x25   :  { %271 = dma.done.wait [#allocation6], 512  }
  0x26   :  { %272 = vsyncadd [#allocation6], 4294966784  ;;  %v279_v0 = vmov 0.0   ;;  %vm280_vm0 = vmmov 0   ;;  %v197_v1 = vld [vmem:[#allocation5] sm:$0xff]   ;;  %v198_v2 = vld [vmem:[#allocation5 + $0x8] sm:$0xff]   ;;  %v140_v27 = vlaneseq }
  0x27   :  { %178 = vmatprep.subr.bf16.mxu0 %v279_v0  ;;  %186 = vmatprep.mubr.msk.bf16.mxu0 %vm280_vm0, %v279_v0  ;;  %v199_v3 = vld [vmem:[#allocation5 + $0x10] sm:$0xff]   ;;  %v200_v4 = vld [vmem:[#allocation5 + $0x18] sm:$0xff]   ;;  %vm75_vm1 = vcmask 523264   ;;  %s281_s13 = smov [#allocation7]  }
  0x28   :  { %179 = vmatpush3.bf16.msra.mxu0 %v197_v1  ;;  %v42_v5 = vld [vmem:[#allocation2] sm:$0xf]  ;;  %v141_v28 = vshrl.u32 %v140_v27, 7  ;;  %s157_s14 = sshll.u32 %s281_s13, 4  ;;  %s158_s14 = int_to_ptr.vmem [resolvable:$true] %s157_s14 }
  0x29   :  { %180 = vmatprep.subr.bf16.mxu0 %v279_v0  ;;  %v137_v29 = vld [vmem:[%s353_s2] sm:$0x1]  ;;  %v172_v34 = vld [vmem:[%s353_s2 + $0x1] ss:$0 sm:$0xff]  ;;  %s247_s15 = scalar_lea.vmem %s158_s14, 128  ;;  %p252_p3 = scmp.lt.s32.totalorder %s158_s14, %s158_s14 }
  0x2a   :  { %v142_v30 = vsub.s32 0, %v141_v28  ;;  %p248_p2 = scmp.ne.s32.totalorder %s158_s14, %s247_s15  ;;  %p253_p4 = scmp.lt.s32.totalorder %s247_s15, %s247_s15 }
  0x2c   :  { %181 = vmatpush3.bf16.msra.mxu0 %v198_v2  ;;  %p254_p5 = por %p253_p4, %p252_p3 }
  0x2d   :  { %182 = vmatprep.subr.bf16.mxu0 %v279_v0 }
  0x2e   :  { %p255_p6 = pnand %p254_p5, %p248_p2 }
  0x30   :  { %183 = vmatpush3.bf16.msra.mxu0 %v199_v3 }
  0x31   :  { %184 = vmatprep.subr.bf16.mxu0 %v279_v0 }
  0x34   :  { %185 = vmatpush3.bf16.msra.mxu0 %v200_v4 }
  0x37   :  { %187 = vmatmul.mubr.msk.bf16.vlgmr.msra.gmra.mrb[0].mxu0 %vm75_vm1, %v42_v5 }
 0x10a   :  { %v113_v6 = vpop.f32.mrb[0].mxu0 }
 0x10b   :  { %v119_v7 = vrot.slane %v113_v6, 4  ;;  %v188_v8 = vpop.f32.mrb[1].mxu0 }
 0x10c   :  { %v116_v9 = vpop.f32.mrb[2].mxu0 }
 0x10d   :  { %v120_v10 = vadd.f32 %v119_v7, %v113_v6  ;;  %v189_v11 = vpop.f32.mrb[3].mxu0 }
 0x10f   :  { %v121_v12 = vrot.slane %v120_v10, 2 }
 0x111   :  { %v122_v13 = vadd.f32 %v121_v12, %v120_v10 }
 0x113   :  { %v123_v14 = vrot.slane %v122_v13, 1 }
 0x115   :  { %v124_v15 = vadd.f32 %v123_v14, %v122_v13 }
 0x117   :  { %v125_v16 = vmul.f32 0.125, %v124_v15 }
 0x119   :  { %v126_v17 = vsub.f32 %v113_v6, %v125_v16 }
 0x11b   :  { %v127_v18 = vmul.f32 %v126_v17, %v126_v17 }
 0x11d   :  { %v128_v19 = vrot.slane %v127_v18, 4 }
 0x11f   :  { %v129_v20 = vadd.f32 %v128_v19, %v127_v18 }
 0x121   :  { %v130_v21 = vrot.slane %v129_v20, 2 }
 0x123   :  { %v131_v22 = vadd.f32 %v130_v21, %v129_v20 }
 0x125   :  { %v132_v23 = vrot.slane %v131_v22, 1 }
 0x127   :  { %v133_v24 = vadd.f32 %v132_v23, %v131_v22 }
 0x129   :  { %v134_v25 = vmul.f32 0.125, %v133_v24 }
 0x12b   :  { %v135_v26 = vadd.f32 1e-05, %v134_v25 }
 0x12d   :  { %201 = vrsqrt.f32 %v135_v26 }
 0x137   :  { %v202_v31 = vpop.eup %201 }
 0x138   :  { %v139_v32 = vmul.f32 %v202_v31, %v137_v29 }
 0x13a   :  { %v143_v33 = vrot.slane %v139_v32, %v142_v30 }
 0x13c   :  { %v144_v35 = vmul.f32 %v143_v33, %v126_v17 }
 0x13e   :  { %v149_v36 = vadd.f32 %v172_v34, %v144_v35 }
 0x140   :  { %150 = vst [vmem:[#allocation7] sm:$0xff] %v149_v36 }
 0x141   :  { %258 = shalt.err (!%p255_p6)
}
 0x142   :  { %s259_s18 = scalar_lea.hbm %s354_s3, 128 }
 0x143   :  { %p260_p7 = scmp.ne.s32.totalorder %s354_s3, %s259_s18  ;;  %p263_p8 = scmp.lt.u32.totalorder %s259_s18, %s354_s3 }
 0x145   :  { %p265_p9 = pnand %p263_p8, %p260_p7 }
 0x147   :  { %268 = shalt.err (!%p265_p9)
}
 0x148   :  { %160 = dma.vmem_to_hbm [thread:$0]  %s158_s14, 128, %s354_s3, [#allocation4]  }
 0x149   :  { %273 = dma.done.wait [#allocation4], 128  }
 0x14a   :  { %274 = vsyncadd [#allocation4], 4294967168 }
 0x14b   :  { %164 = vsyncpa [#allocation3], 1 }
 0x14c   :  { %165 = vsyncpa [#allocation6], 1 }
 0x14d   :  { %166 = vsyncpa [#allocation4], 1 }

</bundles_post_ra>
